<compile_context>
chip_gen: v7x
topology: tpu7x:2x2x1
jax: 0.10.0
libtpu: 0.0.40
codegen_flags: <defaults>
</compile_context>

<pallas_src>
import functools

import jax
import jax.numpy as jnp
from jax.experimental import pallas as pl
from jax.experimental.pallas import tpu as pltpu


def _downsample_kernel(x_ref, w1_ref, w2_ref, down_ref, pool_ref,
                       xpad_ref, ypad_ref, *, W, pad_off):
    # x_ref   : (Bblk, Cin, HW)   bf16  channel-major, spatially flattened
    # w1_ref  : (9, Cout, Cin)    bf16  tap-major conv1 weights (k = kh*3 + kw)
    # w2_ref  : (9, Cout, Cout)   bf16  conv2 weights
    # down_ref: (Bblk, Cout, HW)  DoubleConv output (lane-dense store)
    # pool_ref: (Bblk, Cout, HW)  2x2-max "candidates": every even (row, col)
    #                             anchor holds its 2x2 window max; the 4:1
    #                             anchor gather happens in the wrapper.
    # xpad_ref: (Cin,  2*pad_off + HW) f32 zero-padded conv1 input scratch
    # ypad_ref: (Cout, 2*pad_off + HW) f32 zero-padded conv2 input scratch
    bblk, _, HW = x_ref.shape
    f32 = jnp.float32

    # pad=1 border masks, built in-kernel (no mask input / DMA).
    col = jax.lax.broadcasted_iota(jnp.int32, (1, HW), 1) % W
    mask_l = (col != 0).astype(f32)        # zero where col == 0     (dw = -1)
    mask_r = (col != W - 1).astype(f32)    # zero where col == W - 1 (dw = +1)

    def zero_halo(pad_ref):
        c, lpad = pad_ref.shape
        pad_ref[:, :pad_off] = jnp.zeros((c, pad_off), f32)
        pad_ref[:, pad_off + HW:] = jnp.zeros((c, lpad - pad_off - HW), f32)

    # Halo regions are never written below, so zero them once per invocation.
    zero_halo(xpad_ref)
    zero_halo(ypad_ref)

    def conv3x3_relu(pad_ref, w_ref):
        # 9 per-tap matmuls (Cout, C) @ (C, HW), accumulated in f32 registers.
        # Shifted taps are unaligned static-slice loads from the padded scratch:
        # the zero halo implements the H borders, the column masks the W borders.
        # Elementwise work stays f32; taps cast to bf16 only at the MXU boundary.
        acc = None
        for kh in range(3):
            for kw in range(3):
                dh, dw = kh - 1, kw - 1
                start = pad_off + dh * W + dw
                t = pad_ref[:, start:start + HW]
                if dw == -1:
                    t = t * mask_l
                elif dw == 1:
                    t = t * mask_r
                part = jnp.dot(w_ref[kh * 3 + kw], t.astype(jnp.bfloat16),
                               preferred_element_type=f32)
                acc = part if acc is None else acc + part
        return jnp.maximum(acc, 0.0)

    def shift_down(y, s):
        # z[:, p] = y[:, p + s] (s > 0), zero-filled at the end; only used for
        # the two pool shifts on the register-resident conv output.
        return jnp.concatenate(
            [y[:, s:], jnp.zeros((y.shape[0], s), y.dtype)], axis=1)

    for b in range(bblk):
        xpad_ref[:, pad_off:pad_off + HW] = x_ref[b].astype(f32)
        y1 = conv3x3_relu(xpad_ref, w1_ref)
        ypad_ref[:, pad_off:pad_off + HW] = y1
        y2 = conv3x3_relu(ypad_ref, w2_ref)
        down_ref[b] = y2.astype(down_ref.dtype)

        # 2x2 / stride-2 max-pool candidates, computed while y2 is in registers:
        # horizontal pair max, then vertical pair max.  Anchors (even row, even
        # col) hold the 2x2 window max; the wrapper slices them out (linear cost
        # -- replaces the old O(HW^2) selection matmul).
        a = jnp.maximum(y2, shift_down(y2, 1))
        pool = jnp.maximum(a, shift_down(a, W))
        pool_ref[b] = pool.astype(pool_ref.dtype)


def downsample_forward(x_nchw, w1, w2, *, bblk=None,
                       compute_dtype=jnp.bfloat16, out_dtype=None):
    """x_nchw: (B, Cin, H, W); w1: (Cout, Cin, 3, 3); w2: (Cout, Cout, 3, 3)."""
    B, Cin, H, W = x_nchw.shape
    Cout = w1.shape[0]
    assert H % 2 == 0 and W % 2 == 0
    HW = H * W
    out_dtype = x_nchw.dtype if out_dtype is None else out_dtype

    # Batch blocking: maximize work per grid step while keeping >= 2 parallel
    # steps (v7x has 2 TensorCores) when B allows.
    if bblk is None:
        bblk = B // 2 if (B % 2 == 0 and B >= 2) else 1
    assert B % bblk == 0
    grid_b = B // bblk

    # NCHW -> (B, C, H*W) is a free reshape (no transpose of the image data).
    x_flat = x_nchw.reshape(B, Cin, HW).astype(compute_dtype)
    # Weights -> (9, Cout, Cin) with leading index k = kh*3 + kw.
    w1r = jnp.transpose(w1, (2, 3, 0, 1)).reshape(9, Cout, Cin).astype(compute_dtype)
    w2r = jnp.transpose(w2, (2, 3, 0, 1)).reshape(9, Cout, Cout).astype(compute_dtype)

    # Zero-padded scratch: data sits at a 128-aligned offset so the data store is
    # lane-aligned; per-tap reads are unaligned static-slice loads.
    pad_off = ((W + 1 + 127) // 128) * 128
    lpad = 2 * pad_off + HW

    # Generation-aware VMEM limit: ~3/4 of physical, capped at 64 MiB
    # (-> 48 MiB on v7x's 64 MiB VMEM, 64 MiB on v5e/v6e's 128 MiB).
    try:
        vmem_cap = int(pltpu.get_tpu_info().vmem_capacity_bytes)
    except Exception:
        vmem_cap = 64 * 1024 * 1024
    vmem_limit = min(64 * 1024 * 1024, (3 * vmem_cap) // 4)

    kernel = functools.partial(_downsample_kernel, W=W, pad_off=pad_off)
    down_flat, poolcand_flat = pl.pallas_call(
        kernel,
        out_shape=(
            jax.ShapeDtypeStruct((B, Cout, HW), out_dtype),
            jax.ShapeDtypeStruct((B, Cout, HW), out_dtype),
        ),
        grid_spec=pltpu.PrefetchScalarGridSpec(
            num_scalar_prefetch=0,
            grid=(grid_b,),
            in_specs=[
                pl.BlockSpec((bblk, Cin, HW), lambda i: (i, 0, 0)),
                pl.BlockSpec((9, Cout, Cin), lambda i: (0, 0, 0)),
                pl.BlockSpec((9, Cout, Cout), lambda i: (0, 0, 0)),
            ],
            out_specs=[
                pl.BlockSpec((bblk, Cout, HW), lambda i: (i, 0, 0)),
                pl.BlockSpec((bblk, Cout, HW), lambda i: (i, 0, 0)),
            ],
            scratch_shapes=[
                pltpu.VMEM((Cin, lpad), jnp.float32),
                pltpu.VMEM((Cout, lpad), jnp.float32),
            ],
        ),
        compiler_params=pltpu.CompilerParams(
            dimension_semantics=("parallel",),
            vmem_limit_bytes=vmem_limit,
        ),
    )(x_flat, w1r, w2r)

    down = down_flat.reshape(B, Cout, H, W)          # free reshape back to NCHW
    # 4:1 anchor compaction in XLA (tiny); the 2x2 max itself is in-kernel.
    p = poolcand_flat.reshape(B, Cout, H, W)[:, :, ::2, ::2]
    return down, p


def _reference_forward(x, w1, w2):
    dn = ("NCHW", "OIHW", "NCHW")
    y = jax.lax.conv_general_dilated(
        x, w1, (1, 1), ((1, 1), (1, 1)), dimension_numbers=dn,
        precision=jax.lax.Precision.HIGHEST)
    y = jnp.maximum(y, 0.0)
    y = jax.lax.conv_general_dilated(
        y, w2, (1, 1), ((1, 1), (1, 1)), dimension_numbers=dn,
        precision=jax.lax.Precision.HIGHEST)
    down = jnp.maximum(y, 0.0)
    p = jax.lax.reduce_window(down, -jnp.inf, jax.lax.max,
                              (1, 1, 2, 2), (1, 1, 2, 2), "VALID")
    return down, p


if __name__ == "__main__":
    B, Cin, Cout, H, W = 2, 4, 8, 16, 16

    key = jax.random.PRNGKey(0)
    kx, k1, k2 = jax.random.split(key, 3)
    x = jax.random.normal(kx, (B, Cin, H, W), jnp.float32)
    # Deterministic synthetic parameters (shapes from nn.Conv2d(.., 3, bias=False))
    w1 = jax.random.normal(k1, (Cout, Cin, 3, 3), jnp.float32) * 0.2
    w2 = jax.random.normal(k2, (Cout, Cout, 3, 3), jnp.float32) * 0.2

    down, p = jax.jit(downsample_forward)(x, w1, w2)
    jax.block_until_ready((down, p))

    down_ref, p_ref = _reference_forward(x, w1, w2)
    assert down.shape == (B, Cout, H, W) and p.shape == (B, Cout, H // 2, W // 2)
    max_err_down = float(jnp.max(jnp.abs(down - down_ref)))
    max_err_pool = float(jnp.max(jnp.abs(p - p_ref)))
    # Tolerance accounts for bf16 matmul operands (f32 accumulation) in the kernel.
    assert max_err_down < 6e-2 and max_err_pool < 6e-2, (max_err_down, max_err_pool)

    print("KERNEL_OK")
</pallas_src>

<mosaic_0001>
module attributes {stable_mosaic.version = 11 : i64} {
  func.func @_downsample_kernel(%arg0: i32, %arg1: memref<1x4x256xbf16, #tpu.memory_space<vmem>>, %arg2: memref<9x8x4xbf16, #tpu.memory_space<vmem>>, %arg3: memref<9x8x8xbf16, #tpu.memory_space<vmem>>, %arg4: memref<1x8x256xf32, #tpu.memory_space<vmem>>, %arg5: memref<1x8x256xf32, #tpu.memory_space<vmem>>, %arg6: memref<4x512xf32, #tpu.memory_space<vmem>>, %arg7: memref<8x512xf32, #tpu.memory_space<vmem>>) attributes {dimension_semantics = [#tpu.dimension_semantics<parallel>], iteration_bounds = array<i64: 2>, scalar_prefetch = 0 : i64, scratch_operands = 2 : i64, tpu.core_type = #tpu.core_type<tc>, window_params = [{transform_indices = @transform_0, window_bounds = array<i64: 1, 4, 256>}, {pipeline_mode = #tpu.pipeline_mode<synchronous>, transform_indices = @transform_1, window_bounds = array<i64: 9, 8, 4>}, {pipeline_mode = #tpu.pipeline_mode<synchronous>, transform_indices = @transform_2, window_bounds = array<i64: 9, 8, 8>}, {transform_indices = @transform_3, window_bounds = array<i64: 1, 8, 256>}, {transform_indices = @transform_4, window_bounds = array<i64: 1, 8, 256>}]} {
    %0 = tpu.iota {dimensions = array<i32: 1>} : vector<1x256xi32>
    %c16_i32 = arith.constant 16 : i32
    %c0_i32 = arith.constant 0 : i32
    %1 = arith.cmpi eq, %c16_i32, %c0_i32 : i32
    %c1_i32 = arith.constant 1 : i32
    %2 = arith.select %1, %c1_i32, %c16_i32 : i32
    %3 = vector.broadcast %2 : i32 to vector<1x256xi32>
    %4 = arith.remsi %0, %3 : vector<1x256xi32>
    %c0_i32_0 = arith.constant 0 : i32
    %5 = vector.broadcast %c0_i32_0 : i32 to vector<1x256xi32>
    %6 = arith.cmpi ne, %4, %5 : vector<1x256xi32>
    %c0_i32_1 = arith.constant 0 : i32
    %7 = vector.broadcast %c0_i32_1 : i32 to vector<1x256xi32>
    %8 = arith.cmpi slt, %4, %7 : vector<1x256xi32>
    %c0_i32_2 = arith.constant 0 : i32
    %9 = arith.cmpi slt, %2, %c0_i32_2 : i32
    %10 = vector.broadcast %9 : i1 to vector<1x256xi1>
    %11 = vector.broadcast %10 : vector<1x256xi1> to vector<1x256xi1>
    %12 = arith.xori %8, %11 : vector<1x256xi1>
    %13 = arith.andi %12, %6 : vector<1x256xi1>
    %14 = vector.broadcast %2 : i32 to vector<1x256xi32>
    %15 = arith.addi %4, %14 : vector<1x256xi32>
    %16 = arith.select %13, %15, %4 : vector<1x256xi1>, vector<1x256xi32>
    %c0_i32_3 = arith.constant 0 : i32
    %17 = vector.broadcast %c0_i32_3 : i32 to vector<1x256xi32>
    %18 = arith.cmpi ne, %16, %17 : vector<1x256xi32>
    %19 = arith.extui %18 : vector<1x256xi1> to vector<1x256xi32>
    %20 = arith.sitofp %19 : vector<1x256xi32> to vector<1x256xf32>
    %c15_i32 = arith.constant 15 : i32
    %21 = vector.broadcast %c15_i32 : i32 to vector<1x256xi32>
    %22 = arith.cmpi ne, %16, %21 : vector<1x256xi32>
    %23 = arith.extui %22 : vector<1x256xi1> to vector<1x256xi32>
    %24 = arith.sitofp %23 : vector<1x256xi32> to vector<1x256xf32>
    %cst = arith.constant 0.000000e+00 : f32
    %25 = vector.broadcast %cst : f32 to vector<4x128xf32>
    %c0 = arith.constant 0 : index
    %c0_4 = arith.constant 0 : index
    %26 = vector.load %arg6[%c0, %c0_4] : memref<4x512xf32, #tpu.memory_space<vmem>>, vector<4x128xf32>
    tpu.vector_store %arg6[%c0, %c0_4], %25 {strides = array<i32>} : memref<4x512xf32, #tpu.memory_space<vmem>>, vector<4x128xf32>,
    %cst_5 = arith.constant 0.000000e+00 : f32
    %27 = vector.broadcast %cst_5 : f32 to vector<4x128xf32>
    %c0_6 = arith.constant 0 : index
    %c384 = arith.constant 384 : index
    %28 = vector.load %arg6[%c0_6, %c384] : memref<4x512xf32, #tpu.memory_space<vmem>>, vector<4x128xf32>
    tpu.vector_store %arg6[%c0_6, %c384], %27 {strides = array<i32>} : memref<4x512xf32, #tpu.memory_space<vmem>>, vector<4x128xf32>,
    %cst_7 = arith.constant 0.000000e+00 : f32
    %29 = vector.broadcast %cst_7 : f32 to vector<8x128xf32>
    %c0_8 = arith.constant 0 : index
    %c0_9 = arith.constant 0 : index
    %30 = vector.load %arg7[%c0_8, %c0_9] : memref<8x512xf32, #tpu.memory_space<vmem>>, vector<8x128xf32>
    tpu.vector_store %arg7[%c0_8, %c0_9], %29 {strides = array<i32>} : memref<8x512xf32, #tpu.memory_space<vmem>>, vector<8x128xf32>,
    %cst_10 = arith.constant 0.000000e+00 : f32
    %31 = vector.broadcast %cst_10 : f32 to vector<8x128xf32>
    %c0_11 = arith.constant 0 : index
    %c384_12 = arith.constant 384 : index
    %32 = vector.load %arg7[%c0_11, %c384_12] : memref<8x512xf32, #tpu.memory_space<vmem>>, vector<8x128xf32>
    tpu.vector_store %arg7[%c0_11, %c384_12], %31 {strides = array<i32>} : memref<8x512xf32, #tpu.memory_space<vmem>>, vector<8x128xf32>,
    %c0_13 = arith.constant 0 : index
    %c0_14 = arith.constant 0 : index
    %c0_15 = arith.constant 0 : index
    %33 = vector.load %arg1[%c0_13, %c0_14, %c0_15] : memref<1x4x256xbf16, #tpu.memory_space<vmem>>, vector<1x4x256xbf16>
    %34 = vector.shape_cast %33 : vector<1x4x256xbf16> to vector<4x256xbf16>
    %35 = arith.extf %34 : vector<4x256xbf16> to vector<4x256xf32>
    %c0_16 = arith.constant 0 : index
    %c128 = arith.constant 128 : index
    %36 = vector.load %arg6[%c0_16, %c128] : memref<4x512xf32, #tpu.memory_space<vmem>>, vector<4x256xf32>
    tpu.vector_store %arg6[%c0_16, %c128], %35 {strides = array<i32>} : memref<4x512xf32, #tpu.memory_space<vmem>>, vector<4x256xf32>,
    %c0_17 = arith.constant 0 : index
    %c111 = arith.constant 111 : index
    %37 = vector.load %arg6[%c0_17, %c111] : memref<4x512xf32, #tpu.memory_space<vmem>>, vector<4x256xf32>
    %38 = vector.broadcast %20 : vector<1x256xf32> to vector<4x256xf32>
    %39 = arith.mulf %37, %38 : vector<4x256xf32>
    %c0_18 = arith.constant 0 : index
    %c0_19 = arith.constant 0 : index
    %c0_20 = arith.constant 0 : index
    %40 = vector.load %arg2[%c0_18, %c0_19, %c0_20] : memref<9x8x4xbf16, #tpu.memory_space<vmem>>, vector<1x8x4xbf16>
    %41 = vector.shape_cast %40 : vector<1x8x4xbf16> to vector<8x4xbf16>
    %42 = arith.truncf %39 : vector<4x256xf32> to vector<4x256xbf16>
    %cst_21 = arith.constant dense<0.000000e+00> : vector<8x256xf32>
    %43 = tpu.matmul %41, %42, %cst_21 {dimension_numbers = #tpu.dot_dimension_numbers<[1], [0], [0], [1], [0, 0, 1, 1], [], []>} : vector<8x4xbf16>, vector<4x256xbf16>, vector<8x256xf32> -> vector<8x256xf32>
    %c0_22 = arith.constant 0 : index
    %c112 = arith.constant 112 : index
    %44 = vector.load %arg6[%c0_22, %c112] : memref<4x512xf32, #tpu.memory_space<vmem>>, vector<4x256xf32>
    %c1 = arith.constant 1 : index
    %c0_23 = arith.constant 0 : index
    %c0_24 = arith.constant 0 : index
    %45 = vector.load %arg2[%c1, %c0_23, %c0_24] : memref<9x8x4xbf16, #tpu.memory_space<vmem>>, vector<1x8x4xbf16>
    %46 = vector.shape_cast %45 : vector<1x8x4xbf16> to vector<8x4xbf16>
    %47 = arith.truncf %44 : vector<4x256xf32> to vector<4x256xbf16>
    %cst_25 = arith.constant dense<0.000000e+00> : vector<8x256xf32>
    %48 = tpu.matmul %46, %47, %cst_25 {dimension_numbers = #tpu.dot_dimension_numbers<[1], [0], [0], [1], [0, 0, 1, 1], [], []>} : vector<8x4xbf16>, vector<4x256xbf16>, vector<8x256xf32> -> vector<8x256xf32>
    %49 = arith.addf %43, %48 : vector<8x256xf32>
    %c0_26 = arith.constant 0 : index
    %c113 = arith.constant 113 : index
    %50 = vector.load %arg6[%c0_26, %c113] : memref<4x512xf32, #tpu.memory_space<vmem>>, vector<4x256xf32>
    %51 = vector.broadcast %24 : vector<1x256xf32> to vector<4x256xf32>
    %52 = arith.mulf %50, %51 : vector<4x256xf32>
    %c2 = arith.constant 2 : index
    %c0_27 = arith.constant 0 : index
    %c0_28 = arith.constant 0 : index
    %53 = vector.load %arg2[%c2, %c0_27, %c0_28] : memref<9x8x4xbf16, #tpu.memory_space<vmem>>, vector<1x8x4xbf16>
    %54 = vector.shape_cast %53 : vector<1x8x4xbf16> to vector<8x4xbf16>
    %55 = arith.truncf %52 : vector<4x256xf32> to vector<4x256xbf16>
    %cst_29 = arith.constant dense<0.000000e+00> : vector<8x256xf32>
    %56 = tpu.matmul %54, %55, %cst_29 {dimension_numbers = #tpu.dot_dimension_numbers<[1], [0], [0], [1], [0, 0, 1, 1], [], []>} : vector<8x4xbf16>, vector<4x256xbf16>, vector<8x256xf32> -> vector<8x256xf32>
    %57 = arith.addf %49, %56 : vector<8x256xf32>
    %c0_30 = arith.constant 0 : index
    %c127 = arith.constant 127 : index
    %58 = vector.load %arg6[%c0_30, %c127] : memref<4x512xf32, #tpu.memory_space<vmem>>, vector<4x256xf32>
    %59 = vector.broadcast %20 : vector<1x256xf32> to vector<4x256xf32>
    %60 = arith.mulf %58, %59 : vector<4x256xf32>
    %c3 = arith.constant 3 : index
    %c0_31 = arith.constant 0 : index
    %c0_32 = arith.constant 0 : index
    %61 = vector.load %arg2[%c3, %c0_31, %c0_32] : memref<9x8x4xbf16, #tpu.memory_space<vmem>>, vector<1x8x4xbf16>
    %62 = vector.shape_cast %61 : vector<1x8x4xbf16> to vector<8x4xbf16>
    %63 = arith.truncf %60 : vector<4x256xf32> to vector<4x256xbf16>
    %cst_33 = arith.constant dense<0.000000e+00> : vector<8x256xf32>
    %64 = tpu.matmul %62, %63, %cst_33 {dimension_numbers = #tpu.dot_dimension_numbers<[1], [0], [0], [1], [0, 0, 1, 1], [], []>} : vector<8x4xbf16>, vector<4x256xbf16>, vector<8x256xf32> -> vector<8x256xf32>
    %65 = arith.addf %57, %64 : vector<8x256xf32>
    %c0_34 = arith.constant 0 : index
    %c128_35 = arith.constant 128 : index
    %66 = vector.load %arg6[%c0_34, %c128_35] : memref<4x512xf32, #tpu.memory_space<vmem>>, vector<4x256xf32>
    %c4 = arith.constant 4 : index
    %c0_36 = arith.constant 0 : index
    %c0_37 = arith.constant 0 : index
    %67 = vector.load %arg2[%c4, %c0_36, %c0_37] : memref<9x8x4xbf16, #tpu.memory_space<vmem>>, vector<1x8x4xbf16>
    %68 = vector.shape_cast %67 : vector<1x8x4xbf16> to vector<8x4xbf16>
    %69 = arith.truncf %66 : vector<4x256xf32> to vector<4x256xbf16>
    %cst_38 = arith.constant dense<0.000000e+00> : vector<8x256xf32>
    %70 = tpu.matmul %68, %69, %cst_38 {dimension_numbers = #tpu.dot_dimension_numbers<[1], [0], [0], [1], [0, 0, 1, 1], [], []>} : vector<8x4xbf16>, vector<4x256xbf16>, vector<8x256xf32> -> vector<8x256xf32>
    %71 = arith.addf %65, %70 : vector<8x256xf32>
    %c0_39 = arith.constant 0 : index
    %c129 = arith.constant 129 : index
    %72 = vector.load %arg6[%c0_39, %c129] : memref<4x512xf32, #tpu.memory_space<vmem>>, vector<4x256xf32>
    %73 = vector.broadcast %24 : vector<1x256xf32> to vector<4x256xf32>
    %74 = arith.mulf %72, %73 : vector<4x256xf32>
    %c5 = arith.constant 5 : index
    %c0_40 = arith.constant 0 : index
    %c0_41 = arith.constant 0 : index
    %75 = vector.load %arg2[%c5, %c0_40, %c0_41] : memref<9x8x4xbf16, #tpu.memory_space<vmem>>, vector<1x8x4xbf16>
    %76 = vector.shape_cast %75 : vector<1x8x4xbf16> to vector<8x4xbf16>
    %77 = arith.truncf %74 : vector<4x256xf32> to vector<4x256xbf16>
    %cst_42 = arith.constant dense<0.000000e+00> : vector<8x256xf32>
    %78 = tpu.matmul %76, %77, %cst_42 {dimension_numbers = #tpu.dot_dimension_numbers<[1], [0], [0], [1], [0, 0, 1, 1], [], []>} : vector<8x4xbf16>, vector<4x256xbf16>, vector<8x256xf32> -> vector<8x256xf32>
    %79 = arith.addf %71, %78 : vector<8x256xf32>
    %c0_43 = arith.constant 0 : index
    %c143 = arith.constant 143 : index
    %80 = vector.load %arg6[%c0_43, %c143] : memref<4x512xf32, #tpu.memory_space<vmem>>, vector<4x256xf32>
    %81 = vector.broadcast %20 : vector<1x256xf32> to vector<4x256xf32>
    %82 = arith.mulf %80, %81 : vector<4x256xf32>
    %c6 = arith.constant 6 : index
    %c0_44 = arith.constant 0 : index
    %c0_45 = arith.constant 0 : index
    %83 = vector.load %arg2[%c6, %c0_44, %c0_45] : memref<9x8x4xbf16, #tpu.memory_space<vmem>>, vector<1x8x4xbf16>
    %84 = vector.shape_cast %83 : vector<1x8x4xbf16> to vector<8x4xbf16>
    %85 = arith.truncf %82 : vector<4x256xf32> to vector<4x256xbf16>
    %cst_46 = arith.constant dense<0.000000e+00> : vector<8x256xf32>
    %86 = tpu.matmul %84, %85, %cst_46 {dimension_numbers = #tpu.dot_dimension_numbers<[1], [0], [0], [1], [0, 0, 1, 1], [], []>} : vector<8x4xbf16>, vector<4x256xbf16>, vector<8x256xf32> -> vector<8x256xf32>
    %87 = arith.addf %79, %86 : vector<8x256xf32>
    %c0_47 = arith.constant 0 : index
    %c144 = arith.constant 144 : index
    %88 = vector.load %arg6[%c0_47, %c144] : memref<4x512xf32, #tpu.memory_space<vmem>>, vector<4x256xf32>
    %c7 = arith.constant 7 : index
    %c0_48 = arith.constant 0 : index
    %c0_49 = arith.constant 0 : index
    %89 = vector.load %arg2[%c7, %c0_48, %c0_49] : memref<9x8x4xbf16, #tpu.memory_space<vmem>>, vector<1x8x4xbf16>
    %90 = vector.shape_cast %89 : vector<1x8x4xbf16> to vector<8x4xbf16>
    %91 = arith.truncf %88 : vector<4x256xf32> to vector<4x256xbf16>
    %cst_50 = arith.constant dense<0.000000e+00> : vector<8x256xf32>
    %92 = tpu.matmul %90, %91, %cst_50 {dimension_numbers = #tpu.dot_dimension_numbers<[1], [0], [0], [1], [0, 0, 1, 1], [], []>} : vector<8x4xbf16>, vector<4x256xbf16>, vector<8x256xf32> -> vector<8x256xf32>
    %93 = arith.addf %87, %92 : vector<8x256xf32>
    %c0_51 = arith.constant 0 : index
    %c145 = arith.constant 145 : index
    %94 = vector.load %arg6[%c0_51, %c145] : memref<4x512xf32, #tpu.memory_space<vmem>>, vector<4x256xf32>
    %95 = vector.broadcast %24 : vector<1x256xf32> to vector<4x256xf32>
    %96 = arith.mulf %94, %95 : vector<4x256xf32>
    %c8 = arith.constant 8 : index
    %c0_52 = arith.constant 0 : index
    %c0_53 = arith.constant 0 : index
    %97 = vector.load %arg2[%c8, %c0_52, %c0_53] : memref<9x8x4xbf16, #tpu.memory_space<vmem>>, vector<1x8x4xbf16>
    %98 = vector.shape_cast %97 : vector<1x8x4xbf16> to vector<8x4xbf16>
    %99 = arith.truncf %96 : vector<4x256xf32> to vector<4x256xbf16>
    %cst_54 = arith.constant dense<0.000000e+00> : vector<8x256xf32>
    %100 = tpu.matmul %98, %99, %cst_54 {dimension_numbers = #tpu.dot_dimension_numbers<[1], [0], [0], [1], [0, 0, 1, 1], [], []>} : vector<8x4xbf16>, vector<4x256xbf16>, vector<8x256xf32> -> vector<8x256xf32>
    %101 = arith.addf %93, %100 : vector<8x256xf32>
    %cst_55 = arith.constant 0.000000e+00 : f32
    %102 = vector.broadcast %cst_55 : f32 to vector<8x256xf32>
    %103 = arith.maximumf %101, %102 : vector<8x256xf32>
    %c0_56 = arith.constant 0 : index
    %c128_57 = arith.constant 128 : index
    %104 = vector.load %arg7[%c0_56, %c128_57] : memref<8x512xf32, #tpu.memory_space<vmem>>, vector<8x256xf32>
    tpu.vector_store %arg7[%c0_56, %c128_57], %103 {strides = array<i32>} : memref<8x512xf32, #tpu.memory_space<vmem>>, vector<8x256xf32>,
    %c0_58 = arith.constant 0 : index
    %c111_59 = arith.constant 111 : index
    %105 = vector.load %arg7[%c0_58, %c111_59] : memref<8x512xf32, #tpu.memory_space<vmem>>, vector<8x256xf32>
    %106 = vector.broadcast %20 : vector<1x256xf32> to vector<8x256xf32>
    %107 = arith.mulf %105, %106 : vector<8x256xf32>
    %c0_60 = arith.constant 0 : index
    %c0_61 = arith.constant 0 : index
    %c0_62 = arith.constant 0 : index
    %108 = vector.load %arg3[%c0_60, %c0_61, %c0_62] : memref<9x8x8xbf16, #tpu.memory_space<vmem>>, vector<1x8x8xbf16>
    %109 = vector.shape_cast %108 : vector<1x8x8xbf16> to vector<8x8xbf16>
    %110 = arith.truncf %107 : vector<8x256xf32> to vector<8x256xbf16>
    %cst_63 = arith.constant dense<0.000000e+00> : vector<8x256xf32>
    %111 = tpu.matmul %109, %110, %cst_63 {dimension_numbers = #tpu.dot_dimension_numbers<[1], [0], [0], [1], [0, 0, 1, 1], [], []>} : vector<8x8xbf16>, vector<8x256xbf16>, vector<8x256xf32> -> vector<8x256xf32>
    %c0_64 = arith.constant 0 : index
    %c112_65 = arith.constant 112 : index
    %112 = vector.load %arg7[%c0_64, %c112_65] : memref<8x512xf32, #tpu.memory_space<vmem>>, vector<8x256xf32>
    %c1_66 = arith.constant 1 : index
    %c0_67 = arith.constant 0 : index
    %c0_68 = arith.constant 0 : index
    %113 = vector.load %arg3[%c1_66, %c0_67, %c0_68] : memref<9x8x8xbf16, #tpu.memory_space<vmem>>, vector<1x8x8xbf16>
    %114 = vector.shape_cast %113 : vector<1x8x8xbf16> to vector<8x8xbf16>
    %115 = arith.truncf %112 : vector<8x256xf32> to vector<8x256xbf16>
    %cst_69 = arith.constant dense<0.000000e+00> : vector<8x256xf32>
    %116 = tpu.matmul %114, %115, %cst_69 {dimension_numbers = #tpu.dot_dimension_numbers<[1], [0], [0], [1], [0, 0, 1, 1], [], []>} : vector<8x8xbf16>, vector<8x256xbf16>, vector<8x256xf32> -> vector<8x256xf32>
    %117 = arith.addf %111, %116 : vector<8x256xf32>
    %c0_70 = arith.constant 0 : index
    %c113_71 = arith.constant 113 : index
    %118 = vector.load %arg7[%c0_70, %c113_71] : memref<8x512xf32, #tpu.memory_space<vmem>>, vector<8x256xf32>
    %119 = vector.broadcast %24 : vector<1x256xf32> to vector<8x256xf32>
    %120 = arith.mulf %118, %119 : vector<8x256xf32>
    %c2_72 = arith.constant 2 : index
    %c0_73 = arith.constant 0 : index
    %c0_74 = arith.constant 0 : index
    %121 = vector.load %arg3[%c2_72, %c0_73, %c0_74] : memref<9x8x8xbf16, #tpu.memory_space<vmem>>, vector<1x8x8xbf16>
    %122 = vector.shape_cast %121 : vector<1x8x8xbf16> to vector<8x8xbf16>
    %123 = arith.truncf %120 : vector<8x256xf32> to vector<8x256xbf16>
    %cst_75 = arith.constant dense<0.000000e+00> : vector<8x256xf32>
    %124 = tpu.matmul %122, %123, %cst_75 {dimension_numbers = #tpu.dot_dimension_numbers<[1], [0], [0], [1], [0, 0, 1, 1], [], []>} : vector<8x8xbf16>, vector<8x256xbf16>, vector<8x256xf32> -> vector<8x256xf32>
    %125 = arith.addf %117, %124 : vector<8x256xf32>
    %c0_76 = arith.constant 0 : index
    %c127_77 = arith.constant 127 : index
    %126 = vector.load %arg7[%c0_76, %c127_77] : memref<8x512xf32, #tpu.memory_space<vmem>>, vector<8x256xf32>
    %127 = vector.broadcast %20 : vector<1x256xf32> to vector<8x256xf32>
    %128 = arith.mulf %126, %127 : vector<8x256xf32>
    %c3_78 = arith.constant 3 : index
    %c0_79 = arith.constant 0 : index
    %c0_80 = arith.constant 0 : index
    %129 = vector.load %arg3[%c3_78, %c0_79, %c0_80] : memref<9x8x8xbf16, #tpu.memory_space<vmem>>, vector<1x8x8xbf16>
    %130 = vector.shape_cast %129 : vector<1x8x8xbf16> to vector<8x8xbf16>
    %131 = arith.truncf %128 : vector<8x256xf32> to vector<8x256xbf16>
    %cst_81 = arith.constant dense<0.000000e+00> : vector<8x256xf32>
    %132 = tpu.matmul %130, %131, %cst_81 {dimension_numbers = #tpu.dot_dimension_numbers<[1], [0], [0], [1], [0, 0, 1, 1], [], []>} : vector<8x8xbf16>, vector<8x256xbf16>, vector<8x256xf32> -> vector<8x256xf32>
    %133 = arith.addf %125, %132 : vector<8x256xf32>
    %c0_82 = arith.constant 0 : index
    %c128_83 = arith.constant 128 : index
    %134 = vector.load %arg7[%c0_82, %c128_83] : memref<8x512xf32, #tpu.memory_space<vmem>>, vector<8x256xf32>
    %c4_84 = arith.constant 4 : index
    %c0_85 = arith.constant 0 : index
    %c0_86 = arith.constant 0 : index
    %135 = vector.load %arg3[%c4_84, %c0_85, %c0_86] : memref<9x8x8xbf16, #tpu.memory_space<vmem>>, vector<1x8x8xbf16>
    %136 = vector.shape_cast %135 : vector<1x8x8xbf16> to vector<8x8xbf16>
    %137 = arith.truncf %134 : vector<8x256xf32> to vector<8x256xbf16>
    %cst_87 = arith.constant dense<0.000000e+00> : vector<8x256xf32>
    %138 = tpu.matmul %136, %137, %cst_87 {dimension_numbers = #tpu.dot_dimension_numbers<[1], [0], [0], [1], [0, 0, 1, 1], [], []>} : vector<8x8xbf16>, vector<8x256xbf16>, vector<8x256xf32> -> vector<8x256xf32>
    %139 = arith.addf %133, %138 : vector<8x256xf32>
    %c0_88 = arith.constant 0 : index
    %c129_89 = arith.constant 129 : index
    %140 = vector.load %arg7[%c0_88, %c129_89] : memref<8x512xf32, #tpu.memory_space<vmem>>, vector<8x256xf32>
    %141 = vector.broadcast %24 : vector<1x256xf32> to vector<8x256xf32>
    %142 = arith.mulf %140, %141 : vector<8x256xf32>
    %c5_90 = arith.constant 5 : index
    %c0_91 = arith.constant 0 : index
    %c0_92 = arith.constant 0 : index
    %143 = vector.load %arg3[%c5_90, %c0_91, %c0_92] : memref<9x8x8xbf16, #tpu.memory_space<vmem>>, vector<1x8x8xbf16>
    %144 = vector.shape_cast %143 : vector<1x8x8xbf16> to vector<8x8xbf16>
    %145 = arith.truncf %142 : vector<8x256xf32> to vector<8x256xbf16>
    %cst_93 = arith.constant dense<0.000000e+00> : vector<8x256xf32>
    %146 = tpu.matmul %144, %145, %cst_93 {dimension_numbers = #tpu.dot_dimension_numbers<[1], [0], [0], [1], [0, 0, 1, 1], [], []>} : vector<8x8xbf16>, vector<8x256xbf16>, vector<8x256xf32> -> vector<8x256xf32>
    %147 = arith.addf %139, %146 : vector<8x256xf32>
    %c0_94 = arith.constant 0 : index
    %c143_95 = arith.constant 143 : index
    %148 = vector.load %arg7[%c0_94, %c143_95] : memref<8x512xf32, #tpu.memory_space<vmem>>, vector<8x256xf32>
    %149 = vector.broadcast %20 : vector<1x256xf32> to vector<8x256xf32>
    %150 = arith.mulf %148, %149 : vector<8x256xf32>
    %c6_96 = arith.constant 6 : index
    %c0_97 = arith.constant 0 : index
    %c0_98 = arith.constant 0 : index
    %151 = vector.load %arg3[%c6_96, %c0_97, %c0_98] : memref<9x8x8xbf16, #tpu.memory_space<vmem>>, vector<1x8x8xbf16>
    %152 = vector.shape_cast %151 : vector<1x8x8xbf16> to vector<8x8xbf16>
    %153 = arith.truncf %150 : vector<8x256xf32> to vector<8x256xbf16>
    %cst_99 = arith.constant dense<0.000000e+00> : vector<8x256xf32>
    %154 = tpu.matmul %152, %153, %cst_99 {dimension_numbers = #tpu.dot_dimension_numbers<[1], [0], [0], [1], [0, 0, 1, 1], [], []>} : vector<8x8xbf16>, vector<8x256xbf16>, vector<8x256xf32> -> vector<8x256xf32>
    %155 = arith.addf %147, %154 : vector<8x256xf32>
    %c0_100 = arith.constant 0 : index
    %c144_101 = arith.constant 144 : index
    %156 = vector.load %arg7[%c0_100, %c144_101] : memref<8x512xf32, #tpu.memory_space<vmem>>, vector<8x256xf32>
    %c7_102 = arith.constant 7 : index
    %c0_103 = arith.constant 0 : index
    %c0_104 = arith.constant 0 : index
    %157 = vector.load %arg3[%c7_102, %c0_103, %c0_104] : memref<9x8x8xbf16, #tpu.memory_space<vmem>>, vector<1x8x8xbf16>
    %158 = vector.shape_cast %157 : vector<1x8x8xbf16> to vector<8x8xbf16>
    %159 = arith.truncf %156 : vector<8x256xf32> to vector<8x256xbf16>
    %cst_105 = arith.constant dense<0.000000e+00> : vector<8x256xf32>
    %160 = tpu.matmul %158, %159, %cst_105 {dimension_numbers = #tpu.dot_dimension_numbers<[1], [0], [0], [1], [0, 0, 1, 1], [], []>} : vector<8x8xbf16>, vector<8x256xbf16>, vector<8x256xf32> -> vector<8x256xf32>
    %161 = arith.addf %155, %160 : vector<8x256xf32>
    %c0_106 = arith.constant 0 : index
    %c145_107 = arith.constant 145 : index
    %162 = vector.load %arg7[%c0_106, %c145_107] : memref<8x512xf32, #tpu.memory_space<vmem>>, vector<8x256xf32>
    %163 = vector.broadcast %24 : vector<1x256xf32> to vector<8x256xf32>
    %164 = arith.mulf %162, %163 : vector<8x256xf32>
    %c8_108 = arith.constant 8 : index
    %c0_109 = arith.constant 0 : index
    %c0_110 = arith.constant 0 : index
    %165 = vector.load %arg3[%c8_108, %c0_109, %c0_110] : memref<9x8x8xbf16, #tpu.memory_space<vmem>>, vector<1x8x8xbf16>
    %166 = vector.shape_cast %165 : vector<1x8x8xbf16> to vector<8x8xbf16>
    %167 = arith.truncf %164 : vector<8x256xf32> to vector<8x256xbf16>
    %cst_111 = arith.constant dense<0.000000e+00> : vector<8x256xf32>
    %168 = tpu.matmul %166, %167, %cst_111 {dimension_numbers = #tpu.dot_dimension_numbers<[1], [0], [0], [1], [0, 0, 1, 1], [], []>} : vector<8x8xbf16>, vector<8x256xbf16>, vector<8x256xf32> -> vector<8x256xf32>
    %169 = arith.addf %161, %168 : vector<8x256xf32>
    %cst_112 = arith.constant 0.000000e+00 : f32
    %170 = vector.broadcast %cst_112 : f32 to vector<8x256xf32>
    %171 = arith.maximumf %169, %170 : vector<8x256xf32>
    %c0_113 = arith.constant 0 : index
    %c0_114 = arith.constant 0 : index
    %c0_115 = arith.constant 0 : index
    %172 = vector.load %arg4[%c0_113, %c0_114, %c0_115] : memref<1x8x256xf32, #tpu.memory_space<vmem>>, vector<1x8x256xf32>
    %173 = vector.shape_cast %172 : vector<1x8x256xf32> to vector<8x256xf32>
    %174 = vector.shape_cast %171 : vector<8x256xf32> to vector<1x8x256xf32>
    tpu.vector_store %arg4[%c0_113, %c0_114, %c0_115], %174 {strides = array<i32>} : memref<1x8x256xf32, #tpu.memory_space<vmem>>, vector<1x8x256xf32>,
    %175 = vector.extract_strided_slice %171 {offsets = [0, 1], sizes = [8, 255], strides = [1, 1]} : vector<8x256xf32> to vector<8x255xf32>
    %cst_116 = arith.constant 0.000000e+00 : f32
    %176 = vector.broadcast %cst_116 : f32 to vector<8x1xf32>
    %177 = tpu.concatenate %175, %176 in 1 : vector<8x255xf32>, vector<8x1xf32> -> vector<8x256xf32>
    %178 = arith.maximumf %171, %177 : vector<8x256xf32>
    %179 = vector.extract_strided_slice %178 {offsets = [0, 16], sizes = [8, 240], strides = [1, 1]} : vector<8x256xf32> to vector<8x240xf32>
    %cst_117 = arith.constant 0.000000e+00 : f32
    %180 = vector.broadcast %cst_117 : f32 to vector<8x16xf32>
    %181 = tpu.concatenate %179, %180 in 1 : vector<8x240xf32>, vector<8x16xf32> -> vector<8x256xf32>
    %182 = arith.maximumf %178, %181 : vector<8x256xf32>
    %c0_118 = arith.constant 0 : index
    %c0_119 = arith.constant 0 : index
    %c0_120 = arith.constant 0 : index
    %183 = vector.load %arg5[%c0_118, %c0_119, %c0_120] : memref<1x8x256xf32, #tpu.memory_space<vmem>>, vector<1x8x256xf32>
    %184 = vector.shape_cast %183 : vector<1x8x256xf32> to vector<8x256xf32>
    %185 = vector.shape_cast %182 : vector<8x256xf32> to vector<1x8x256xf32>
    tpu.vector_store %arg5[%c0_118, %c0_119, %c0_120], %185 {strides = array<i32>} : memref<1x8x256xf32, #tpu.memory_space<vmem>>, vector<1x8x256xf32>,
    return
  }
  func.func @transform_0(%arg0: i32) -> (i32, i32, i32) {
    %c0_i32 = arith.constant 0 : i32
    %c0_i32_0 = arith.constant 0 : i32
    %c0_i32_1 = arith.constant 0 : i32
    return %arg0, %c0_i32, %c0_i32_0 : i32, i32, i32
  }
  func.func @transform_1(%arg0: i32) -> (i32, i32, i32) {
    %c0_i32 = arith.constant 0 : i32
    %c0_i32_0 = arith.constant 0 : i32
    %c0_i32_1 = arith.constant 0 : i32
    %c0_i32_2 = arith.constant 0 : i32
    return %c0_i32, %c0_i32_0, %c0_i32_1 : i32, i32, i32
  }
  func.func @transform_2(%arg0: i32) -> (i32, i32, i32) {
    %c0_i32 = arith.constant 0 : i32
    %c0_i32_0 = arith.constant 0 : i32
    %c0_i32_1 = arith.constant 0 : i32
    %c0_i32_2 = arith.constant 0 : i32
    return %c0_i32, %c0_i32_0, %c0_i32_1 : i32, i32, i32
  }
  func.func @transform_3(%arg0: i32) -> (i32, i32, i32) {
    %c0_i32 = arith.constant 0 : i32
    %c0_i32_0 = arith.constant 0 : i32
    %c0_i32_1 = arith.constant 0 : i32
    return %arg0, %c0_i32, %c0_i32_0 : i32, i32, i32
  }
  func.func @transform_4(%arg0: i32) -> (i32, i32, i32) {
    %c0_i32 = arith.constant 0 : i32
    %c0_i32_0 = arith.constant 0 : i32
    %c0_i32_1 = arith.constant 0 : i32
    return %arg0, %c0_i32, %c0_i32_0 : i32, i32, i32
  }
}

</mosaic_0001>

<bundles_post_ra>
// kernel: downsample_forward.1
= control target key start
LH: loop header
LB: loop body
LE: loop exit
PB: predicated region body
PF: predicated region fallthrough
CT: control target
= control target key end

     0   :  { %s1986_s15 = smov 0   ;;  %s2327_s0 = inlined_call_operand.vmem [shape: bf16[2,4,256], index: 0, kind: input, shape index: {}]   ;;  %s2328_s1 = inlined_call_operand.vmem [shape: bf16[9,8,4], index: 1, kind: input, shape index: {}]   ;;  %s2329_s2 = inlined_call_operand.vmem [shape: bf16[9,8,8], index: 2, kind: input, shape index: {}]   ;;  %s2330_s3 = inlined_call_operand.vmem [shape: f32[2,8,256], index: 3, kind: output, shape index: {0}]   ;;  %s2331_s4 = inlined_call_operand.vmem [shape: f32[2,8,256], index: 4, kind: output, shape index: {1}]  }
   0x1 LB: > { %s1755_s16 = sadd.s32 4294967295, %s1948_s15   ;;  %p1759_p0 = scmp.ge.s32.totalorder %s1948_s15, 1  ;;  %s1948_s15 = sphi %s1986_s15, %s15_s15  }
   0x2   : > { %p165_p1 = scmp.lt.s32.totalorder %s1948_s15, 3 }
   0x4   : > { %p166_p2 = pnand %p1759_p0, %p165_p1 }
   0x5   : > { %v212_v0 = vlaneseq (!%p166_p2)  ;;  %v1950_v1 = vmov (!%p166_p2), 0.0   ;;  %p196_p3 = scmp.lt.s32.totalorder (!%p166_p2), %s1755_s16, 1  ;;  %s1951_s21 = smov (!%p166_p2), 111   ;;  %v1957_v20 = vmov (!%p166_p2), 0   ;;  %vm266_vm4 = vcmask (!%p166_p2), 908288  }
   0x6   : > { %169 = sbr.rel (%p166_p2) target bundleno = 1338 (0x53a), region = 32  ;;  %251 = vst [vmem:[#allocation2] sm:$0xf] (!%p166_p2), %v1950_v1  ;;  %252 = vst [vmem:[#allocation2 + $0xc] sm:$0xf] (!%p166_p2), %v1950_v1  ;;  %s1952_s22 = smov (!%p166_p2), 127   ;;  %342 = vmatprep.mubr.bf16.mxu0 (!%p166_p2), %v1957_v20  ;;  %1046 = vmatprep.mubr.bf16.mxu1 (!%p166_p2), %v1957_v20 }
   0x7   : > { %v213_v2 = vand.u32 (!%p166_p2), 127, %v212_v0  ;;  %s1953_s23 = smov (!%p166_p2), 113   ;;  %s1954_s24 = smov (!%p166_p2), 1   ;;  %vm421_vm5 = vcmask (!%p166_p2), 924672   ;;  %vm504_vm6 = vcmask (!%p166_p2), 1039360   ;;  %vm296_vm7 = vcmask (!%p166_p2), 130048  }
   0x8   : > { %s1955_s25 = smov (!%p166_p2), 16   ;;  %s1956_s26 = smov (!%p166_p2), 15   ;;  %vm303_vm8 = vcmask (!%p166_p2), 1041408   ;;  %vm527_vm9 = vcmask (!%p166_p2), 7168   ;;  %v1770_v55 = vld [vmem:[%s2328_s1 + $0x4] sm:$0xf] (!%p166_p2) }
   0x9   : > { %v214_v3 = vadd.s32 (!%p166_p2), 128, %v213_v2  ;;  %v219_v4 = vand.u32 (!%p166_p2), 15, %v213_v2  ;;  %s1958_s27 = smov (!%p166_p2), 17   ;;  %vm299_vm10 = vcmask (!%p166_p2), 31744   ;;  %vm444_vm11 = vcmask (!%p166_p2), 121856   ;;  %s1959_s30 = smov (!%p166_p2), 112  }
   0xa   : > { %vm360_vm12 = vcmask (!%p166_p2), 138240   ;;  %vm827_vm13 = vcmask (!%p166_p2), 916480   ;;  %vm1007_vm14 = vcmask (!%p166_p2), 1043456   ;;  %vm1003_vm15 = vcmask (!%p166_p2), 64512  }
   0xb   : > { %v226_v5 = vand.u32 (!%p166_p2), 15, %v214_v3  ;;  %vm239_vm0 = vcmp.ne.s32.totalorder (!%p166_p2), %v219_v4, 0  ;;  %vm245_vm1 = vcmp.ne.s32.totalorder (!%p166_p2), %v219_v4, 15 }
   0xc   : > { %v1997_v6 = vsel (!%p166_p2), %vm239_vm0, 1.0, %v1950_v1  ;;  %v2007_v9 = vsel (!%p166_p2), %vm245_vm1, 1.0, %v1950_v1 }
   0xd   : > { %s2333_s16 = smov (!%p196_p3, %s1755_s16), 1  ;;  %vm240_vm2 = vcmp.ne.s32.totalorder %v226_v5, 0  ;;  %vm246_vm3 = vcmp.ne.s32.totalorder %v226_v5, 15  ;;  %v643_v62 = vld [vmem:[#allocation2 + $0xc] sm:$0xf] }
   0xe   : > { %s1824_s17 = sshll.u32 %s2333_s16, 2  ;;  %v2005_v8 = vsel %vm240_vm2, 1.0, %v1950_v1  ;;  %v2009_v10 = vsel %vm246_vm3, 1.0, %v1950_v1  ;;  %s1825_s19 = sshll.u32 %s2333_s16, 4 }
   0xf   : > { %s2002_s20 = scalar_lea.vmem %s2327_s0, %s1824_s17  ;;  %v262_v12 = vcombine.low %v1997_v6, %v2005_v8  ;;  %v2019_v13 = vcombine.low %v2007_v9, %v2009_v10  ;;  %s205_s29 = scalar_lea.vmem %s2330_s3, %s1825_s19 }
  0x10   : > { %v255_v7 = vld [vmem:[%s2002_s20] sm:$0xf] }
  0x11   : > { %v2011_v11 = vunpack.c.l.bf16 %v255_v7  ;;  %263 = vrot.lane.b32.xlu0 %v262_v12, %s1951_s21  ;;  %501 = vrot.lane.b32.xlu1 %v262_v12, %s1952_s22  ;;  %v726_v7 = vld [vmem:[#allocation2 + $0xc] sm:$0xf] }
  0x13   : > { %257 = vst [vmem:[#allocation2 + $0x4] sm:$0xff] %v2011_v11 }
  0x15   : > { %418 = vrot.lane.b32.xlu0 %v2019_v13, %s1953_s23  ;;  %644 = vrot.lane.b32.xlu1 %v2019_v13, %s1954_s24 }
  0x1a   : > { %v258_v14 = vld [vmem:[#allocation2] sm:$0xff]  ;;  %v259_v15 = vld [vmem:[#allocation2 + $0x8] sm:$0xf] }
  0x1b   : > { %v282_v16 = vcombine.high %v258_v14, %v258_v14  ;;  %v284_v17 = vpack.c.bf16 %v258_v14, %v258_v14  ;;  %v286_v19 = vpack.c.bf16 %v259_v15, %v259_v15  ;;  %v414_v36 = vld [vmem:[#allocation2 + $0x8] sm:$0xf] }
  0x1c   : > { %v500_v51 = vld [vmem:[#allocation2 + $0x8] sm:$0xf] }
  0x1d   : > { %v285_v18 = vpack.c.bf16 %v282_v16, %v282_v16  ;;  %290 = vrot.lane.b32.xlu0 %v284_v17, %s1955_s25 }
  0x1f   : > { %292 = vrot.lane.b32.xlu1 %v285_v18, %s1955_s25  ;;  %v813_v18 = vcombine.high %v2011_v11, %v2011_v11 }
  0x21   : > { %294 = vrot.lane.b32.xlu0 %v286_v19, %s1955_s25  ;;  %v2067_v19 = vld [vmem:[%s2002_s20] ss:$0 sps:$4 sm:$0xff]  }
  0x23   : > { %727 = vrot.lane.b32.xlu1 %v262_v12, %s1956_s26 }
  0x83   : > { %v264_v21 = vpop.permute.xlu0 %263  ;;  %v502_v24 = vpop.permute.xlu1 %501 }
  0x84   : > { %v265_v22 = vrot.slane %v264_v21, 4  ;;  %v503_v32 = vrot.slane %v502_v24, 4 }
  0x86   : > { %v267_v23 = vsel %vm266_vm4, %v265_v22, %v264_v21  ;;  %v271_v28 = vmul.f32 %v265_v22, %v259_v15  ;;  %v505_v40 = vsel %vm504_vm6, %v503_v32, %v502_v24  ;;  %v509_v57 = vmul.f32 %v503_v32, %v500_v51  ;;  %v809_v21 = vld [vmem:[#allocation2 + $0xc] sm:$0xf] }
  0x87   : > { %v270_v25 = vmul.f32 %v267_v23, %v258_v14  ;;  %v419_v26 = vpop.permute.xlu0 %418  ;;  %v645_v33 = vpop.permute.xlu1 %644  ;;  %v508_v49 = vmul.f32 %v505_v40, %v258_v14  ;;  %v816_v22 = vpack.c.bf16 %v813_v18, %v813_v18  ;;  %v817_v23 = vpack.c.bf16 %v809_v21, %v809_v21  ;;  %v883_v40 = vld [vmem:[#allocation2 + $0xc] sm:$0xf] }
  0x88   : > { %v420_v27 = vrot.slane %v419_v26, 4  ;;  %v278_v38 = vpack.c.bf16 %v271_v28, %v271_v28  ;;  %v646_v45 = vrot.slane %v645_v33, 4  ;;  %v517_v63 = vpack.c.bf16 %v509_v57, %v509_v57 }
  0x89   : > { %v276_v29 = vpack.c.bf16 %v270_v25, %v270_v25  ;;  %v274_v30 = vcombine.high %v270_v25, %v270_v25  ;;  %v513_v53 = vcombine.high %v508_v49, %v508_v49  ;;  %v515_v58 = vpack.c.bf16 %v508_v49, %v508_v49  ;;  %v1775_v49 = vld [vmem:[%s2328_s1 + $0x8] sm:$0xf] }
  0x8a   : > { %v422_v31 = vsel %vm421_vm5, %v420_v27, %v419_v26  ;;  %v426_v42 = vmul.f32 %v420_v27, %v414_v36  ;;  %v648_v56 = vsel %vm527_vm9, %v646_v45, %v645_v33  ;;  %v652_v2 = vmul.f32 %v646_v45, %v643_v62 }
  0x8b   : > { %v425_v34 = vmul.f32 %v422_v31, %v258_v14  ;;  %354 = vrot.lane.b32.xlu0 %v276_v29, %s1958_s27  ;;  %v277_v35 = vpack.c.bf16 %v274_v30, %v274_v30  ;;  %v516_v60 = vpack.c.bf16 %v513_v53, %v513_v53  ;;  %v651_v61 = vmul.f32 %v648_v56, %v2011_v11  ;;  %v272_v31 = vld [vmem:[%s2328_s1] sm:$0xf]  ;;  %v1778_v56 = vld [vmem:[%s2328_s1 + $0xc] sm:$0xf] }
  0x8c   : > { %v434_v52 = vpack.c.bf16 %v426_v42, %v426_v42  ;;  %v660_v12 = vpack.c.bf16 %v652_v2, %v652_v2  ;;  %v2101_v53 = vpack.i.bf16 %v2005_v8, %v1997_v6  ;;  %v594_v57 = vsel %vm303_vm8, %v2067_v19, 0 }
  0x8d   : > { %356 = vrot.lane.b32.xlu1 %v277_v35, %s1958_s27  ;;  %v430_v39 = vcombine.high %v425_v34, %v425_v34  ;;  %v432_v43 = vpack.c.bf16 %v425_v34, %v425_v34  ;;  %v656_v0 = vcombine.high %v651_v61, %v651_v61  ;;  %v658_v3 = vpack.c.bf16 %v651_v61, %v651_v61  ;;  %v1781_v61 = vld [vmem:[%s2328_s1 + $0x10] sm:$0xf] }
  0x8f   : > { %v291_v37 = vpop.permute.xlu0 %290  ;;  %358 = vrot.lane.b32.xlu0 %v278_v38, %s1958_s27  ;;  %v433_v48 = vpack.c.bf16 %v430_v39, %v430_v39  ;;  %v659_v5 = vpack.c.bf16 %v656_v0, %v656_v0 }
  0x91   : > { %v293_v41 = vpop.permute.xlu1 %292  ;;  %438 = vrot.lane.b32.xlu1 %v432_v43, %s1956_s26 }
  0x92   : > { %v297_v44 = vsel %vm296_vm7, %v291_v37, %v293_v41 }
  0x93   : > { %v295_v46 = vpop.permute.xlu0 %294  ;;  %v305_v47 = vsel %vm303_vm8, %v297_v44, 0  ;;  %440 = vrot.lane.b32.xlu0 %v433_v48, %s1956_s26 }
  0x94   : > { %v298_v50 = vsel %vm296_vm7, %v293_v41, %v295_v46 }
  0x95   : > { %1771 = vmatprep.subr.msk.bf16.mxu0 %vm303_vm8, %v298_v50  ;;  %v728_v54 = vpop.permute.xlu1 %727  ;;  %442 = vrot.lane.b32.xlu1 %v434_v52, %s1956_s26 }
  0x96   : > { %311 = vmatpush1.bf16.msra.mxu0 %v305_v47  ;;  %v729_v59 = vrot.slane %v728_v54, 4 }
  0x97   : > { %884 = vrot.lane.b32.xlu0 %v2019_v13, %s1958_s27 }
  0x98   : > { %v731_v1 = vsel %vm444_vm11, %v729_v59, %v728_v54  ;;  %v735_v14 = vmul.f32 %v729_v59, %v726_v7 }
  0x99   : > { %1772 = vmatmul.mubr.msk.bf16.vlgmr.msra.gmra.mrb[0].mxu0 %vm299_vm10, %v1770_v55  ;;  %521 = vrot.lane.b32.xlu1 %v515_v58, %s1954_s24  ;;  %v734_v4 = vmul.f32 %v731_v1, %v2011_v11  ;;  %v2108_v55 = vpack.i.bf16 %v2009_v10, %v2007_v9 }
  0x9a   : > { %404 = vmatprep.mubr.bf16.mxu0 %v1957_v20  ;;  %v743_v17 = vpack.c.bf16 %v735_v14, %v735_v14 }
  0x9b   : > { %523 = vrot.lane.b32.xlu0 %v516_v60, %s1954_s24  ;;  %v739_v13 = vcombine.high %v734_v4, %v734_v4  ;;  %v741_v15 = vpack.c.bf16 %v734_v4, %v734_v4  ;;  %v1784_v4 = vld [vmem:[%s2328_s1 + $0x14] sm:$0xf] }
  0x9d   : > { %525 = vrot.lane.b32.xlu1 %v517_v63, %s1954_s24  ;;  %v742_v16 = vpack.c.bf16 %v739_v13, %v739_v13  ;;  %v1787_v13 = vld [vmem:[%s2328_s1 + $0x18] sm:$0xf] }
  0x9f   : > { %664 = vrot.lane.b32.xlu0 %v658_v3, %s1952_s22 }
  0xa1   : > { %666 = vrot.lane.b32.xlu1 %v659_v5, %s1952_s22 }
  0xa3   : > { %668 = vrot.lane.b32.xlu0 %v660_v12, %s1952_s22 }
  0xa5   : > { %747 = vrot.lane.b32.xlu1 %v741_v15, %s1953_s23  ;;  %v1790_v15 = vld [vmem:[%s2328_s1 + $0x1c] sm:$0xf] }
  0xa7   : > { %749 = vrot.lane.b32.xlu0 %v742_v16, %s1953_s23 }
  0xa9   : > { %751 = vrot.lane.b32.xlu1 %v743_v17, %s1953_s23 }
  0xab   : > { %821 = vrot.lane.b32.xlu0 %v2067_v19, %s1959_s30 }
  0xad   : > { %823 = vrot.lane.b32.xlu1 %v816_v22, %s1959_s30 }
  0xaf   : > { %825 = vrot.lane.b32.xlu0 %v817_v23, %s1959_s30  ;;  %v1793_v23 = vld [vmem:[%s2328_s1 + $0x20] sm:$0xf] }
  0xfd   : > { %v355_v24 = vpop.permute.xlu0 %354 }
  0xff   : > { %v357_v25 = vpop.permute.xlu1 %356 }
 0x100   : > { %v361_v26 = vsel %vm360_vm12, %v355_v24, %v357_v25  ;;  %v1960_v24 = vmov 0.0|0.0  }
 0x101   : > { %v359_v27 = vpop.permute.xlu0 %358  ;;  %v367_v29 = vsel %vm303_vm8, %v361_v26, 0 }
 0x102   : > { %v362_v28 = vsel %vm360_vm12, %v357_v25, %v359_v27 }
 0x103   : > { %1773 = vmatprep.subr.msk.bf16.mxu0 %vm303_vm8, %v362_v28  ;;  %v439_v30 = vpop.permute.xlu1 %438 }
 0x104   : > { %373 = vmatpush1.bf16.msra.mxu0 %v367_v29 }
 0x105   : > { %v441_v32 = vpop.permute.xlu0 %440 }
 0x106   : > { %v445_v33 = vsel %vm444_vm11, %v439_v30, %v441_v32 }
 0x107   : > { %v443_v34 = vpop.permute.xlu1 %442  ;;  %1774 = vmatmul.mubr.msk.bf16.vlgmr.msra.gmra.mrb[0].mxu0 %vm299_vm10, %v272_v31  ;;  %v451_v36 = vsel %vm303_vm8, %v445_v33, 0 }
 0x108   : > { %v446_v35 = vsel %vm444_vm11, %v441_v32, %v443_v34  ;;  %488 = vmatprep.mubr.bf16.mxu0 %v1957_v20 }
 0x109   : > { %v885_v37 = vpop.permute.xlu0 %884  ;;  %1776 = vmatprep.subr.msk.bf16.mxu0 %vm303_vm8, %v446_v35 }
 0x10a   : > { %v886_v38 = vrot.slane %v885_v37, 4  ;;  %457 = vmatpush1.bf16.msra.mxu0 %v451_v36 }
 0x10b   : > { %v522_v39 = vpop.permute.xlu1 %521 }
 0x10c   : > { %v888_v41 = vsel %vm360_vm12, %v886_v38, %v885_v37  ;;  %v892_v45 = vmul.f32 %v886_v38, %v883_v40 }
 0x10d   : > { %v891_v42 = vmul.f32 %v888_v41, %v2011_v11  ;;  %v524_v43 = vpop.permute.xlu0 %523 }
 0x10e   : > { %v528_v44 = vsel %vm527_vm9, %v522_v39, %v524_v43  ;;  %v900_v11 = vpack.c.bf16 %v892_v45, %v892_v45 }
 0x10f   : > { %v898_v46 = vpack.c.bf16 %v891_v42, %v891_v42  ;;  %v896_v47 = vcombine.high %v891_v42, %v891_v42  ;;  %v526_v48 = vpop.permute.xlu1 %525  ;;  %v534_v52 = vsel %vm303_vm8, %v528_v44, 0 }
 0x110   : > { %v529_v50 = vsel %vm527_vm9, %v524_v43, %v526_v48 }
 0x111   : > { %904 = vrot.lane.b32.xlu1 %v898_v46, %s1951_s21  ;;  %v899_v51 = vpack.c.bf16 %v896_v47, %v896_v47  ;;  %1779 = vmatprep.subr.msk.bf16.mxu0 %vm303_vm8, %v529_v50  ;;  %v665_v54 = vpop.permute.xlu0 %664 }
 0x113   : > { %906 = vrot.lane.b32.xlu0 %v899_v51, %s1951_s21  ;;  %1777 = vmatmul.mubr.msk.bf16.vlgmr.msra.gmra.mrb[0].mxu0 %vm299_vm10, %v1775_v49  ;;  %v667_v8 = vpop.permute.xlu1 %666 }
 0x114   : > { %540 = vmatpush1.bf16.msra.mxu0 %v534_v52  ;;  %571 = vmatprep.mubr.bf16.mxu0 %v1957_v20  ;;  %v671_v58 = vsel %vm504_vm6, %v665_v54, %v667_v8 }
 0x115   : > { %908 = vrot.lane.b32.xlu1 %v900_v11, %s1951_s21  ;;  %1782 = vmatprep.subr.msk.bf16.mxu0 %vm303_vm8, %v816_v22  ;;  %v669_v6 = vpop.permute.xlu0 %668  ;;  %v677_v62 = vsel %vm303_vm8, %v671_v58, 0 }
 0x116   : > { %v672_v9 = vsel %vm504_vm6, %v667_v8, %v669_v6 }
 0x117   : > { %1911 = vrot.lane.b32.xlu0 %v2101_v53, %s1951_s21  ;;  %v748_v10 = vpop.permute.xlu1 %747 }
 0x119   : > { %1916 = vrot.lane.b32.xlu1 %v2108_v55, %s1953_s23  ;;  %v750_v59 = vpop.permute.xlu0 %749 }
 0x11a   : > { %v754_v1 = vsel %vm421_vm5, %v748_v10, %v750_v59 }
 0x11b   : > { %1921 = vrot.lane.b32.xlu0 %v2101_v53, %s1952_s22  ;;  %v752_v60 = vpop.permute.xlu1 %751  ;;  %v760_v5 = vsel %vm303_vm8, %v754_v1, 0 }
 0x11c   : > { %v755_v63 = vsel %vm421_vm5, %v750_v59, %v752_v60 }
 0x11d   : > { %1926 = vrot.lane.b32.xlu1 %v2108_v55, %s1954_s24  ;;  %v822_v0 = vpop.permute.xlu0 %821 }
 0x11f   : > { %1780 = vmatmul.mubr.msk.bf16.vlgmr.msra.gmra.mrb[0].mxu0 %vm299_vm10, %v1778_v56  ;;  %v824_v3 = vpop.permute.xlu1 %823  ;;  %995 = vrot.lane.b32.xlu0 %v1960_v24, %s1955_s25 }
 0x120   : > { %600 = vmatpush1.bf16.msra.mxu0 %v594_v57  ;;  %631 = vmatprep.mubr.bf16.mxu0 %v1957_v20  ;;  %v828_v12 = vsel %vm827_vm13, %v822_v0, %v824_v3 }
 0x121   : > { %1785 = vmatprep.subr.msk.bf16.mxu0 %vm303_vm8, %v672_v9  ;;  %v826_v2 = vpop.permute.xlu0 %825  ;;  %v834_v14 = vsel %vm303_vm8, %v828_v12, 0 }
 0x122   : > { %v829_v7 = vsel %vm827_vm13, %v824_v3, %v826_v2 }
 0x12b   : > { %1783 = vmatmul.mubr.msk.bf16.vlgmr.msra.gmra.mrb[0].mxu0 %vm299_vm10, %v1781_v61 }
 0x12c   : > { %683 = vmatpush1.bf16.msra.mxu0 %v677_v62  ;;  %714 = vmatprep.mubr.bf16.mxu0 %v1957_v20 }
 0x12d   : > { %1788 = vmatprep.subr.msk.bf16.mxu0 %vm303_vm8, %v755_v63 }
 0x137   : > { %1786 = vmatmul.mubr.msk.bf16.vlgmr.msra.gmra.mrb[0].mxu0 %vm299_vm10, %v1784_v4 }
 0x138   : > { %766 = vmatpush1.bf16.msra.mxu0 %v760_v5  ;;  %797 = vmatprep.mubr.bf16.mxu0 %v1957_v20 }
 0x139   : > { %1791 = vmatprep.subr.msk.bf16.mxu0 %vm303_vm8, %v829_v7 }
 0x143   : > { %1789 = vmatmul.mubr.msk.bf16.vlgmr.msra.gmra.mrb[0].mxu0 %vm299_vm10, %v1787_v13 }
 0x144   : > { %840 = vmatpush1.bf16.msra.mxu0 %v834_v14  ;;  %871 = vmatprep.mubr.bf16.mxu0 %v1957_v20 }
 0x14f   : > { %1792 = vmatmul.mubr.msk.bf16.vlgmr.msra.gmra.mrb[0].mxu0 %vm299_vm10, %v1790_v15 }
 0x150   : > { %954 = vmatprep.mubr.bf16.mxu0 %v1957_v20 }
 0x183   : > { %v905_v16 = vpop.permute.xlu1 %904 }
 0x185   : > { %v907_v17 = vpop.permute.xlu0 %906 }
 0x186   : > { %v911_v18 = vsel %vm266_vm4, %v905_v16, %v907_v17  ;;  %v1796_v16 = vld [vmem:[%s2329_s2 + $0x4] sm:$0xf] }
 0x187   : > { %v909_v19 = vpop.permute.xlu1 %908  ;;  %v917_v22 = vsel %vm303_vm8, %v911_v18, 0 }
 0x188   : > { %v912_v21 = vsel %vm266_vm4, %v907_v17, %v909_v19 }
 0x189   : > { %1794 = vmatprep.subr.msk.bf16.mxu0 %vm303_vm8, %v912_v21  ;;  %v1912_v25 = vpop.permute.xlu0 %1911 }
 0x18a   : > { %923 = vmatpush1.bf16.msra.mxu0 %v917_v22  ;;  %v1914_v26 = vunpack.i.h.bf16 %v1912_v25  ;;  %v1913_v27 = vunpack.i.l.bf16 %v1912_v25 }
 0x18b   : > { %v1917_v36 = vpop.permute.xlu1 %1916 }
 0x18c   : > { %v980_v31 = vmul.f32 0.0, %v1913_v27  ;;  %v976_v38 = vsel %vm266_vm4, %v1913_v27, %v1914_v26  ;;  %v1919_v39 = vunpack.i.h.bf16 %v1917_v36  ;;  %v1918_v40 = vunpack.i.l.bf16 %v1917_v36 }
 0x18d   : > { %1795 = vmatmul.mubr.msk.bf16.vlgmr.msra.gmra.mrb[0].mxu0 %vm299_vm10, %v1793_v23  ;;  %v1922_v46 = vpop.permute.xlu0 %1921 }
 0x18e   : > { %v984_v41 = vpack.c.bf16 %v980_v31, %v980_v31  ;;  %v1124_v44 = vmul.f32 0.0, %v1918_v40  ;;  %v1120_v45 = vsel %vm421_vm5, %v1918_v40, %v1919_v39  ;;  %v1924_v50 = vunpack.i.h.bf16 %v1922_v46 }
 0x18f   : > { %v1923_v51 = vunpack.i.l.bf16 %v1922_v46  ;;  %v1927_v6 = vpop.permute.xlu1 %1926 }
 0x190   : > { %v1129_v52 = vpack.c.bf16 %v1124_v44, %v1124_v44  ;;  %v1929_v57 = vunpack.i.h.bf16 %v1927_v6  ;;  %v1928_v9 = vunpack.i.l.bf16 %v1927_v6 }
 0x191   : > { %v1199_v8 = vsel %vm504_vm6, %v1923_v51, %v1924_v50  ;;  %v996_v4 = vpop.permute.xlu0 %995 }
 0x192   : > { %v1335_v62 = vsel %vm527_vm9, %v1928_v9, %v1929_v57  ;;  %v1341_v63 = vmul.f32 0.0, %v1929_v57 }
 0x260   : > { %v956_v28 = vpop.f32.mrb[0].mxu0 }
 0x261   : > { %v2167_v29 = vmax.f32 %v956_v28, 0.0  ;;  %v958_v30 = vpop.f32.mrb[1].mxu0 }
 0x262   : > { %v2169_v32 = vmax.f32 %v958_v30, 0.0  ;;  %v960_v33 = vpop.f32.mrb[2].mxu0 }
 0x263   : > { %v961_v34 = vpop.f32.mrb[3].mxu0  ;;  %v2173_v35 = vpack.c.bf16 %v2167_v29, %v2167_v29  ;;  %v981_v42 = vmul.f32 %v976_v38, %v2167_v29  ;;  %v1125_v49 = vmul.f32 %v1120_v45, %v2167_v29  ;;  %v1204_v10 = vmul.f32 %v1199_v8, %v2167_v29 }
 0x264   : > { %v2177_v37 = vpack.c.bf16 %v2169_v32, %v2169_v32  ;;  %v982_v43 = vmul.f32 %v1914_v26, %v2169_v32  ;;  %v1126_v11 = vmul.f32 %v1919_v39, %v2169_v32  ;;  %v1205_v59 = vmul.f32 %v1924_v50, %v2169_v32 }
 0x265   : > { %997 = vrot.lane.b32.xlu1 %v2173_v35, %s1955_s25  ;;  %v985_v47 = vpack.c.bf16 %v981_v42, %v981_v42  ;;  %v1130_v54 = vpack.c.bf16 %v1125_v49, %v1125_v49  ;;  %v1339_v60 = vmul.f32 %v1928_v9, %v2167_v29  ;;  %v1209_v61 = vpack.c.bf16 %v1204_v10, %v1204_v10  ;;  %v983_v42 = vld [vmem:[%s2329_s2] sm:$0xf]  ;;  %v1804_v9 = vld [vmem:[%s2329_s2 + $0xc] sm:$0xf] }
 0x266   : > { %999 = vrot.lane.b32.xlu0 %v2177_v37, %s1955_s25  ;;  %v986_v48 = vpack.c.bf16 %v982_v43, %v982_v43  ;;  %v1131_v56 = vpack.c.bf16 %v1126_v11, %v1126_v11  ;;  %v1210_v0 = vpack.c.bf16 %v1205_v59, %v1205_v59  ;;  %v1340_v1 = vmul.f32 %v1335_v62, %v2169_v32  ;;  %s210_s25 = scalar_lea.vmem %s2331_s4, %s1825_s19 }
 0x267   : > { %v1344_v2 = vpack.c.bf16 %v1339_v60, %v1339_v60  ;;  %v1280_v59 = vsel %vm1007_vm14, %v2173_v35, 0 }
 0x268   : > { %v1345_v3 = vpack.c.bf16 %v1340_v1, %v1340_v1 }
 0x269   : > { %1931 = vrot.lane.b32.xlu1 %v2101_v53, %s1956_s26  ;;  %v1203_v53 = vmul.f32 0.0, %v1923_v51 }
 0x26a   : > { %1058 = vrot.lane.b32.xlu0 %v984_v41, %s1958_s27 }
 0x26b   : > { %v1208_v58 = vpack.c.bf16 %v1203_v53, %v1203_v53 }
 0x26d   : > { %1060 = vrot.lane.b32.xlu1 %v985_v47, %s1958_s27 }
 0x26e   : > { %1062 = vrot.lane.b32.xlu0 %v986_v48, %s1958_s27 }
 0x271   : > { %1135 = vrot.lane.b32.xlu1 %v1129_v52, %s1956_s26 }
 0x272   : > { %1137 = vrot.lane.b32.xlu0 %v1130_v54, %s1956_s26 }
 0x275   : > { %1139 = vrot.lane.b32.xlu1 %v1131_v56, %s1956_s26 }
 0x276   : > { %1936 = vrot.lane.b32.xlu0 %v2108_v55, %s1958_s27  ;;  %v1346_v55 = vpack.c.bf16 %v1341_v63, %v1341_v63 }
 0x279   : > { %1214 = vrot.lane.b32.xlu1 %v1208_v58, %s1954_s24 }
 0x27a   : > { %1216 = vrot.lane.b32.xlu0 %v1209_v61, %s1954_s24  ;;  %v1807_v61 = vld [vmem:[%s2329_s2 + $0x10] sm:$0xf] }
 0x27d   : > { %1218 = vrot.lane.b32.xlu1 %v1210_v0, %s1954_s24 }
 0x27e   : > { %1350 = vrot.lane.b32.xlu0 %v1344_v2, %s1952_s22 }
 0x281   : > { %1352 = vrot.lane.b32.xlu1 %v1345_v3, %s1952_s22 }
 0x282   : > { %1354 = vrot.lane.b32.xlu0 %v1346_v55, %s1952_s22 }
 0x2d7   : > { %v998_v5 = vpop.permute.xlu1 %997 }
 0x2d8   : > { %v1000_v7 = vpop.permute.xlu0 %999  ;;  %v1001_v12 = vsel %vm296_vm7, %v996_v4, %v998_v5 }
 0x2d9   : > { %v1002_v13 = vsel %vm296_vm7, %v998_v5, %v1000_v7  ;;  %v1009_v14 = vsel %vm1007_vm14, %v1001_v12, 0  ;;  %v1813_v5 = vld [vmem:[%s2329_s2 + $0x18] sm:$0xf] }
 0x2da   : > { %1797 = vmatprep.subr.msk.bf16.mxu1 %vm1007_vm14, %v1002_v13 }
 0x2db   : > { %1015 = vmatpush1.bf16.msra.mxu1 %v1009_v14  ;;  %v1932_v15 = vpop.permute.xlu1 %1931 }
 0x2dc   : > { %v1934_v17 = vunpack.i.h.bf16 %v1932_v15  ;;  %v1933_v18 = vunpack.i.l.bf16 %v1932_v15  ;;  %v1059_v19 = vpop.permute.xlu0 %1058 }
 0x2de   : > { %v1418_v21 = vmul.f32 %v1933_v18, %v2167_v29  ;;  %1798 = vmatmul.mubr.msk.bf16.vlgmr.msra.gmra.mrb[0].mxu1 %vm1003_vm15, %v1796_v16  ;;  %v1414_v22 = vsel %vm444_vm11, %v1933_v18, %v1934_v17  ;;  %v1420_v26 = vmul.f32 0.0, %v1934_v17 }
 0x2df   : > { %v1061_v23 = vpop.permute.xlu1 %1060  ;;  %v1419_v25 = vmul.f32 %v1414_v22, %v2169_v32  ;;  %1107 = vmatprep.mubr.bf16.mxu1 %v1957_v20  ;;  %v1816_v22 = vld [vmem:[%s2329_s2 + $0x1c] sm:$0xf] }
 0x2e0   : > { %v1064_v27 = vsel %vm360_vm12, %v1059_v19, %v1061_v23  ;;  %v1063_v28 = vpop.permute.xlu0 %1062  ;;  %v1423_v30 = vpack.c.bf16 %v1418_v21, %v1418_v21  ;;  %v1425_v39 = vpack.c.bf16 %v1420_v26, %v1420_v26 }
 0x2e1   : > { %v1070_v31 = vsel %vm1007_vm14, %v1064_v27, 0  ;;  %v1065_v33 = vsel %vm360_vm12, %v1061_v23, %v1063_v28  ;;  %v1424_v34 = vpack.c.bf16 %v1419_v25, %v1419_v25  ;;  %v1819_v25 = vld [vmem:[%s2329_s2 + $0x20] sm:$0xf] }
 0x2e2   : > { %1799 = vmatprep.subr.msk.bf16.mxu1 %vm1007_vm14, %v1065_v33  ;;  %1429 = vrot.lane.b32.xlu1 %v1423_v30, %s1953_s23 }
 0x2e3   : > { %1076 = vmatpush1.bf16.msra.mxu1 %v1070_v31  ;;  %v1136_v36 = vpop.permute.xlu1 %1135  ;;  %1431 = vrot.lane.b32.xlu0 %v1424_v34, %s1953_s23 }
 0x2e4   : > { %v1138_v38 = vpop.permute.xlu0 %1137 }
 0x2e5   : > { %v1141_v40 = vsel %vm444_vm11, %v1136_v36, %v1138_v38 }
 0x2e6   : > { %1433 = vrot.lane.b32.xlu1 %v1425_v39, %s1953_s23  ;;  %v1147_v47 = vsel %vm1007_vm14, %v1141_v40, 0 }
 0x2e7   : > { %v1140_v41 = vpop.permute.xlu1 %1139  ;;  %1497 = vrot.lane.b32.xlu0 %v2173_v35, %s1959_s30  ;;  %v1810_v35 = vld [vmem:[%s2329_s2 + $0x14] sm:$0xf] }
 0x2e8   : > { %v1142_v43 = vsel %vm444_vm11, %v1138_v38, %v1140_v41  ;;  %v1937_v44 = vpop.permute.xlu0 %1936 }
 0x2e9   : > { %v1939_v45 = vunpack.i.h.bf16 %v1937_v44  ;;  %v1938_v46 = vunpack.i.l.bf16 %v1937_v44  ;;  %1802 = vmatprep.subr.msk.bf16.mxu1 %vm1007_vm14, %v1142_v43 }
 0x2ea   : > { %1800 = vmatmul.mubr.msk.bf16.vlgmr.msra.gmra.mrb[0].mxu1 %vm1003_vm15, %v983_v42  ;;  %1499 = vrot.lane.b32.xlu1 %v2177_v37, %s1959_s30 }
 0x2eb   : > { %v1567_v48 = vmul.f32 0.0, %v1939_v45  ;;  %v1565_v49 = vmul.f32 %v1938_v46, %v2167_v29  ;;  %1153 = vmatpush1.bf16.msra.mxu1 %v1147_v47  ;;  %v1215_v50 = vpop.permute.xlu1 %1214  ;;  %1501 = vrot.lane.b32.xlu0 %v1960_v24, %s1959_s30  ;;  %v1561_v51 = vsel %vm360_vm12, %v1938_v46, %v1939_v45 }
 0x2ec   : > { %v1566_v52 = vmul.f32 %v1561_v51, %v2169_v32  ;;  %1184 = vmatprep.mubr.bf16.mxu1 %v1957_v20  ;;  %v1217_v53 = vpop.permute.xlu0 %1216  ;;  %v1801_v32 = vld [vmem:[%s2329_s2 + $0x8] sm:$0xf] }
 0x2ed   : > { %v1570_v11 = vpack.c.bf16 %v1565_v49, %v1565_v49  ;;  %v1572_v8 = vpack.c.bf16 %v1567_v48, %v1567_v48  ;;  %v1220_v24 = vsel %vm527_vm9, %v1215_v50, %v1217_v53 }
 0x2ee   : > { %v1571_v54 = vpack.c.bf16 %v1566_v52, %v1566_v52  ;;  %v1226_v56 = vsel %vm1007_vm14, %v1220_v24, 0 }
 0x2ef   : > { %v1219_v6 = vpop.permute.xlu1 %1218  ;;  %1576 = vrot.lane.b32.xlu1 %v1570_v11, %s1951_s21 }
 0x2f0   : > { %v1221_v29 = vsel %vm527_vm9, %v1217_v53, %v1219_v6  ;;  %1578 = vrot.lane.b32.xlu0 %v1571_v54, %s1951_s21  ;;  %v1351_v57 = vpop.permute.xlu0 %1350 }
 0x2f1   : > { %1805 = vmatprep.subr.msk.bf16.mxu1 %vm1007_vm14, %v1221_v29 }
 0x2f3   : > { %1580 = vrot.lane.b32.xlu1 %v1572_v8, %s1951_s21  ;;  %v1353_v10 = vpop.permute.xlu1 %1352 }
 0x2f4   : > { %v1355_v58 = vpop.permute.xlu0 %1354 }
 0x2f5   : > { %v1357_v60 = vsel %vm504_vm6, %v1353_v10, %v1355_v58 }
 0x2f6   : > { %1803 = vmatmul.mubr.msk.bf16.vlgmr.msra.gmra.mrb[0].mxu1 %vm1003_vm15, %v1801_v32 }
 0x2f7   : > { %1232 = vmatpush1.bf16.msra.mxu1 %v1226_v56  ;;  %1263 = vmatprep.mubr.bf16.mxu1 %v1957_v20 }
 0x2f8   : > { %1808 = vmatprep.subr.msk.bf16.mxu1 %vm1007_vm14, %v2177_v37  ;;  %v1356_v37 = vsel %vm504_vm6, %v1351_v57, %v1353_v10 }
 0x2f9   : > { %v1362_v62 = vsel %vm1007_vm14, %v1356_v37, 0 }
 0x302   : > { %1806 = vmatmul.mubr.msk.bf16.vlgmr.msra.gmra.mrb[0].mxu1 %vm1003_vm15, %v1804_v9 }
 0x303   : > { %1286 = vmatpush1.bf16.msra.mxu1 %v1280_v59  ;;  %1317 = vmatprep.mubr.bf16.mxu1 %v1957_v20 }
 0x304   : > { %1811 = vmatprep.subr.msk.bf16.mxu1 %vm1007_vm14, %v1357_v60 }
 0x30e   : > { %1809 = vmatmul.mubr.msk.bf16.vlgmr.msra.gmra.mrb[0].mxu1 %vm1003_vm15, %v1807_v61 }
 0x30f   : > { %1368 = vmatpush1.bf16.msra.mxu1 %v1362_v62  ;;  %1399 = vmatprep.mubr.bf16.mxu1 %v1957_v20 }
 0x31a   : > { %1812 = vmatmul.mubr.msk.bf16.vlgmr.msra.gmra.mrb[0].mxu1 %vm1003_vm15, %v1810_v35 }
 0x31b   : > { %1478 = vmatprep.mubr.bf16.mxu1 %v1957_v20 }
 0x354   : > { %v1430_v63 = vpop.permute.xlu1 %1429 }
 0x355   : > { %v1432_v0 = vpop.permute.xlu0 %1431 }
 0x356   : > { %v1435_v1 = vsel %vm421_vm5, %v1430_v63, %v1432_v0 }
 0x357   : > { %v1441_v4 = vsel %vm1007_vm14, %v1435_v1, 0 }
 0x358   : > { %v1434_v2 = vpop.permute.xlu1 %1433 }
 0x359   : > { %v1436_v55 = vsel %vm421_vm5, %v1432_v0, %v1434_v2  ;;  %v1498_v3 = vpop.permute.xlu0 %1497 }
 0x35a   : > { %1814 = vmatprep.subr.msk.bf16.mxu1 %vm1007_vm14, %v1436_v55 }
 0x35b   : > { %1447 = vmatpush1.bf16.msra.mxu1 %v1441_v4 }
 0x35c   : > { %v1500_v7 = vpop.permute.xlu1 %1499 }
 0x35d   : > { %v1503_v12 = vsel %vm827_vm13, %v1498_v3, %v1500_v7  ;;  %v1502_v13 = vpop.permute.xlu0 %1501 }
 0x35e   : > { %v1509_v14 = vsel %vm1007_vm14, %v1503_v12, 0  ;;  %v1504_v15 = vsel %vm827_vm13, %v1500_v7, %v1502_v13  ;;  %1815 = vmatmul.mubr.msk.bf16.vlgmr.msra.gmra.mrb[0].mxu1 %vm1003_vm15, %v1813_v5 }
 0x35f   : > { %1817 = vmatprep.subr.msk.bf16.mxu1 %vm1007_vm14, %v1504_v15  ;;  %1546 = vmatprep.mubr.bf16.mxu1 %v1957_v20 }
 0x360   : > { %1515 = vmatpush1.bf16.msra.mxu1 %v1509_v14 }
 0x361   : > { %v1577_v16 = vpop.permute.xlu1 %1576 }
 0x362   : > { %v1579_v17 = vpop.permute.xlu0 %1578 }
 0x363   : > { %v1582_v21 = vsel %vm266_vm4, %v1577_v16, %v1579_v17 }
 0x364   : > { %v1588_v23 = vsel %vm1007_vm14, %v1582_v21, 0 }
 0x365   : > { %v1581_v18 = vpop.permute.xlu1 %1580 }
 0x366   : > { %v1583_v19 = vsel %vm266_vm4, %v1579_v17, %v1581_v18 }
 0x367   : > { %1820 = vmatprep.subr.msk.bf16.mxu1 %vm1007_vm14, %v1583_v19 }
 0x36a   : > { %1818 = vmatmul.mubr.msk.bf16.vlgmr.msra.gmra.mrb[0].mxu1 %vm1003_vm15, %v1816_v22 }
 0x36b   : > { %1594 = vmatpush1.bf16.msra.mxu1 %v1588_v23  ;;  %1625 = vmatprep.mubr.bf16.mxu1 %v1957_v20 }
 0x376   : > { %1821 = vmatmul.mubr.msk.bf16.vlgmr.msra.gmra.mrb[0].mxu1 %vm1003_vm15, %v1819_v25 }
 0x449   : > { %v1627_v26 = vpop.f32.mrb[0].mxu1 }
 0x44a   : > { %v1636_v27 = vmax.f32 %v1627_v26, 0.0  ;;  %v1629_v28 = vpop.f32.mrb[1].mxu1 }
 0x44b   : > { %v1637_v30 = vmax.f32 %v1629_v28, 0.0  ;;  %v1631_v31 = vpop.f32.mrb[2].mxu1 }
 0x44c   : > { %1638 = vst [vmem:[%s205_s29] sm:$0xff] %v1636_v27  ;;  %1642 = vrot.lane.b32.xlu0 %v1636_v27, %s1952_s22  ;;  %v1632_v20 = vpop.f32.mrb[3].mxu1 }
 0x44d   : > { %1639 = vst [vmem:[%s205_s29 + $0x8] sm:$0xff] %v1637_v30  ;;  %1644 = vrot.lane.b32.xlu1 %v1637_v30, %s1952_s22 }
 0x4be   : > { %v1643_v33 = vpop.permute.xlu0 %1642 }
 0x4bf   : > { %v1645_v34 = vpop.permute.xlu1 %1644 }
 0x4c0   : > { %v1646_v36 = vsel %vm504_vm6, %v1643_v33, %v1645_v34  ;;  %v1649_v38 = vsel %vm504_vm6, %v1645_v34, 0.0 }
 0x4c1   : > { %v1650_v39 = vmax.f32 %v1636_v27, %v1646_v36  ;;  %v1651_v40 = vmax.f32 %v1637_v30, %v1649_v38 }
 0x4c3   : > { %1656 = vrot.lane.b32.xlu1 %v1651_v40, %s1959_s30  ;;  %1654 = vrot.lane.b32.xlu0 %v1650_v39, %s1959_s30 }
 0x535   : > { %v1657_v41 = vpop.permute.xlu1 %1656  ;;  %v1655_v42 = vpop.permute.xlu0 %1654 }
 0x536   : > { %v1662_v43 = vsel %vm827_vm13, %v1657_v41, 0.0  ;;  %v1659_v44 = vsel %vm827_vm13, %v1655_v42, %v1657_v41 }
 0x537   : > { %v1664_v45 = vmax.f32 %v1651_v40, %v1662_v43  ;;  %v1663_v46 = vmax.f32 %v1650_v39, %v1659_v44 }
 0x539   : > { %1666 = vst [vmem:[%s210_s25 + $0x8] sm:$0xff] %v1664_v45  ;;  %1665 = vst [vmem:[%s210_s25] sm:$0xff] %v1663_v46 }
 0x53a PF: > { %s15_s15 = sadd.s32 1, %s1948_s15  }
 0x53b   : > { %p12_p4 = scmp.ge.s32.totalorder %s15_s15, 4  }
 0x53d   :  { %14 = sbr.rel (!%p12_p4) target bundleno = 1 (0x1), region = 90 }

</bundles_post_ra>
